<compile_context>
chip_gen: v7x
topology: tpu7x:2x2x1
jax: 0.10.0
libtpu: 0.0.40
codegen_flags: <defaults>
</compile_context>

<pallas_src>
import math

import jax
import jax.numpy as jnp
from jax.experimental import pallas as pl
from jax.experimental.pallas import tpu as pltpu


# ---------------------------------------------------------------------------
# Kernel: y[i, n] = sum_k x[i, k] @ W_eff[k, n]  + b_eff[n]
# ---------------------------------------------------------------------------
def noisy_linear_kernel(x_ref, w_ref, b_ref, out_ref, acc_ref):
    k = pl.program_id(2)

    @pl.when(k == 0)
    def _():
        acc_ref[...] = jnp.zeros_like(acc_ref)

    # bf16 x bf16 -> f32 accumulation on the MXU.
    acc_ref[...] += jnp.dot(x_ref[...], w_ref[...],
                            preferred_element_type=jnp.float32)

    @pl.when(k == pl.num_programs(2) - 1)
    def _():
        out_ref[...] = (acc_ref[...] + b_ref[...]).astype(out_ref.dtype)


# ---------------------------------------------------------------------------
# Layout helpers
# ---------------------------------------------------------------------------
_LANE = 128        # lane (last-dim) granularity
_SUBLANE_BF16 = 16 # sublane granularity for bf16 operands


def _round_up(x: int, m: int) -> int:
    return (x + m - 1) // m * m


def _pad_and_tile(dim: int, tile_target: int) -> tuple[int, int]:
    """Round `dim` up to a lane-full padded size and pick a tile that divides it."""
    padded = _round_up(dim, _LANE)
    if padded <= tile_target:
        return padded, padded
    padded = _round_up(padded, tile_target)
    return padded, tile_target


def pack_params(params):
    """Pre-combine the noisy weight/bias, pre-transpose to (fan_in, fan_out),
    zero-pad to lane-full shapes, and cast the weight to bf16."""
    out_dim, in_dim = params["weight_mu"].shape
    in_p, tk = _pad_and_tile(in_dim, 512)     # K tile
    out_p, tn = _pad_and_tile(out_dim, 256)   # N tile (256 fills v6e/v7x MXU)

    # Combine in f32, then cast once (fused by XLA; runs once per reset_noise).
    w_eff = params["weight_mu"] + params["weight_sigma"] * params["weight_epsilon"]
    b_eff = params["bias_mu"] + params["bias_sigma"] * params["bias_epsilon"]

    w_eff = jnp.pad(w_eff.T, ((0, in_p - in_dim), (0, out_p - out_dim)))
    w_eff = w_eff.astype(jnp.bfloat16)                       # (in_p, out_p) bf16
    b_eff = jnp.pad(b_eff.reshape(1, -1),
                    ((0, 0), (0, out_p - out_dim)))          # (1, out_p) f32

    return dict(w_eff=w_eff, b_eff=b_eff,
                in_dim=in_dim, out_dim=out_dim, tk=tk, tn=tn)


# ---------------------------------------------------------------------------
# Forward wrapper
# ---------------------------------------------------------------------------
def noisy_linear_forward(x, params, *, block_b: int = 512):
    """x: (B, in_features) float32. params: dict from init_noisy_linear."""
    B, in_dim = x.shape

    packed = pack_params(params)
    assert in_dim == packed["in_dim"], "x fan-in does not match parameters"
    out_dim = packed["out_dim"]
    in_p, out_p = packed["w_eff"].shape
    tk, tn = packed["tk"], packed["tn"]

    # Batch tile: multiple of 16 (bf16 sublanes), sized so the last tile pads
    # at most 15 rows instead of up to block_b-1.
    n_btiles = pl.cdiv(B, block_b)
    tb = _round_up(pl.cdiv(B, n_btiles), _SUBLANE_BF16)
    B_p = _round_up(B, tb)

    x_p = x.astype(jnp.bfloat16)
    if (B_p, in_p) != (B, in_dim):
        x_p = jnp.pad(x_p, ((0, B_p - B), (0, in_p - in_dim)))

    grid = (B_p // tb, out_p // tn, in_p // tk)

    x_spec = pl.BlockSpec((tb, tk), lambda i, n, k: (i, k))
    w_spec = pl.BlockSpec((tk, tn), lambda i, n, k: (k, n))
    b_spec = pl.BlockSpec((1, tn), lambda i, n, k: (0, n))
    o_spec = pl.BlockSpec((tb, tn), lambda i, n, k: (i, n))  # lane-dense output

    cost = pl.CostEstimate(
        flops=2 * B_p * in_p * out_p,
        bytes_accessed=(B_p * in_p * 2          # x (bf16)
                        + in_p * out_p * 2      # W_eff (bf16)
                        + out_p * 4             # b_eff (f32)
                        + B_p * out_p * 4),     # y (f32)
        transcendentals=0,
    )

    y_padded = pl.pallas_call(
        noisy_linear_kernel,
        out_shape=jax.ShapeDtypeStruct((B_p, out_p), jnp.float32),
        grid=grid,
        in_specs=[x_spec, w_spec, b_spec],
        out_specs=o_spec,
        scratch_shapes=[pltpu.VMEM((tb, tn), jnp.float32)],
        compiler_params=pltpu.CompilerParams(
            dimension_semantics=("parallel", "parallel", "arbitrary")),
        cost_estimate=cost,
    )(x_p, packed["w_eff"], packed["b_eff"])

    return y_padded[:B, :out_dim]


# ---------------------------------------------------------------------------
# Parameter / noise initialization (mirrors the PyTorch module's formulas,
# deterministic via jax.random).  reset_noise is host-side state in the
# reference module, so it stays outside the kernel here too.
# ---------------------------------------------------------------------------
def scale_noise(key, size):
    """Factorized gaussian noise: sign(x) * sqrt(|x|), x ~ N(0, 1)."""
    x = jax.random.normal(key, (size,), jnp.float32)
    return jnp.sign(x) * jnp.sqrt(jnp.abs(x))


def init_noisy_linear(key, in_features, out_features, std_init=0.5):
    k_wmu, k_bmu, k_ein, k_eout = jax.random.split(key, 4)
    mu_range = 1.0 / math.sqrt(in_features)

    weight_mu = jax.random.uniform(
        k_wmu, (out_features, in_features), jnp.float32, -mu_range, mu_range)
    weight_sigma = jnp.full(
        (out_features, in_features), std_init / math.sqrt(in_features), jnp.float32)
    bias_mu = jax.random.uniform(
        k_bmu, (out_features,), jnp.float32, -mu_range, mu_range)
    bias_sigma = jnp.full(
        (out_features,), std_init / math.sqrt(out_features), jnp.float32)

    eps_in = scale_noise(k_ein, in_features)
    eps_out = scale_noise(k_eout, out_features)
    weight_epsilon = jnp.outer(eps_out, eps_in)
    bias_epsilon = eps_out

    return dict(weight_mu=weight_mu, weight_sigma=weight_sigma,
                weight_epsilon=weight_epsilon,
                bias_mu=bias_mu, bias_sigma=bias_sigma,
                bias_epsilon=bias_epsilon)


def reference_forward(x, p):
    w = p["weight_mu"] + p["weight_sigma"] * p["weight_epsilon"]
    b = p["bias_mu"] + p["bias_sigma"] * p["bias_epsilon"]
    return x @ w.T + b


# ---------------------------------------------------------------------------
if __name__ == "__main__":
    key = jax.random.PRNGKey(0)
    kx, kp = jax.random.split(key)

    batch, in_features, out_features = 4, 32, 8
    x = jax.random.normal(kx, (batch, in_features), jnp.float32)
    params = init_noisy_linear(kp, in_features, out_features, std_init=0.5)

    y = noisy_linear_forward(x, params)
    y = jax.block_until_ready(y)

    y_ref = reference_forward(x, params)
    assert y.shape == (batch, out_features)
    # bf16 operands (f32 accumulation) vs f32 reference -> loosened tolerance.
    assert jnp.allclose(y, y_ref, atol=2e-2, rtol=2e-2), "mismatch vs JAX reference"

    print("KERNEL_OK")
</pallas_src>

<mosaic_0001>
module attributes {stable_mosaic.version = 11 : i64} {
  func.func @noisy_linear_kernel(%arg0: i32, %arg1: i32, %arg2: i32, %arg3: memref<16x128xbf16, #tpu.memory_space<vmem>>, %arg4: memref<128x128xbf16, #tpu.memory_space<vmem>>, %arg5: memref<1x128xf32, #tpu.memory_space<vmem>>, %arg6: memref<16x128xf32, #tpu.memory_space<vmem>>, %arg7: memref<16x128xf32, #tpu.memory_space<vmem>>) attributes {dimension_semantics = [#tpu.dimension_semantics<parallel>, #tpu.dimension_semantics<parallel>, #tpu.dimension_semantics<arbitrary>], iteration_bounds = array<i64: 1, 1, 1>, scalar_prefetch = 0 : i64, scratch_operands = 1 : i64, tpu.core_type = #tpu.core_type<tc>, window_params = [{transform_indices = @transform_0, window_bounds = array<i64: 16, 128>}, {transform_indices = @transform_1, window_bounds = array<i64: 128, 128>}, {transform_indices = @transform_2, window_bounds = array<i64: 1, 128>}, {transform_indices = @transform_3, window_bounds = array<i64: 16, 128>}]} {
    %c0_i32 = arith.constant 0 : i32
    %0 = arith.cmpi eq, %arg2, %c0_i32 : i32
    %1 = arith.extui %0 : i1 to i32
    %c0_i32_0 = arith.constant 0 : i32
    %2 = arith.cmpi ne, %1, %c0_i32_0 : i32
    scf.if %2 {
      %cst_10 = arith.constant 0.000000e+00 : f32
      %12 = vector.broadcast %cst_10 : f32 to vector<16x128xf32>
      %c0_11 = arith.constant 0 : index
      %c0_12 = arith.constant 0 : index
      %13 = vector.load %arg7[%c0_11, %c0_12] : memref<16x128xf32, #tpu.memory_space<vmem>>, vector<16x128xf32>
      tpu.vector_store %arg7[%c0_11, %c0_12], %12 {strides = array<i32>} : memref<16x128xf32, #tpu.memory_space<vmem>>, vector<16x128xf32>,
    } else {
    }
    %c0 = arith.constant 0 : index
    %c0_1 = arith.constant 0 : index
    %3 = vector.load %arg7[%c0, %c0_1] : memref<16x128xf32, #tpu.memory_space<vmem>>, vector<16x128xf32>
    %c0_2 = arith.constant 0 : index
    %c0_3 = arith.constant 0 : index
    %4 = vector.load %arg3[%c0_2, %c0_3] : memref<16x128xbf16, #tpu.memory_space<vmem>>, vector<16x128xbf16>
    %c0_4 = arith.constant 0 : index
    %c0_5 = arith.constant 0 : index
    %5 = vector.load %arg4[%c0_4, %c0_5] : memref<128x128xbf16, #tpu.memory_space<vmem>>, vector<128x128xbf16>
    %cst = arith.constant dense<0.000000e+00> : vector<16x128xf32>
    %6 = tpu.matmul %4, %5, %cst {dimension_numbers = #tpu.dot_dimension_numbers<[1], [0], [0], [1], [0, 0, 1, 1], [], []>} : vector<16x128xbf16>, vector<128x128xbf16>, vector<16x128xf32> -> vector<16x128xf32>
    %7 = arith.addf %3, %6 : vector<16x128xf32>
    %c0_6 = arith.constant 0 : index
    %c0_7 = arith.constant 0 : index
    %8 = vector.load %arg7[%c0_6, %c0_7] : memref<16x128xf32, #tpu.memory_space<vmem>>, vector<16x128xf32>
    tpu.vector_store %arg7[%c0_6, %c0_7], %7 {strides = array<i32>} : memref<16x128xf32, #tpu.memory_space<vmem>>, vector<16x128xf32>,
    %c0_i32_8 = arith.constant 0 : i32
    %9 = arith.cmpi eq, %arg2, %c0_i32_8 : i32
    %10 = arith.extui %9 : i1 to i32
    %c0_i32_9 = arith.constant 0 : i32
    %11 = arith.cmpi ne, %10, %c0_i32_9 : i32
    scf.if %11 {
      %c0_10 = arith.constant 0 : index
      %c0_11 = arith.constant 0 : index
      %12 = vector.load %arg7[%c0_10, %c0_11] : memref<16x128xf32, #tpu.memory_space<vmem>>, vector<16x128xf32>
      %c0_12 = arith.constant 0 : index
      %c0_13 = arith.constant 0 : index
      %13 = vector.load %arg5[%c0_12, %c0_13] : memref<1x128xf32, #tpu.memory_space<vmem>>, vector<1x128xf32>
      %14 = vector.broadcast %13 : vector<1x128xf32> to vector<16x128xf32>
      %15 = arith.addf %12, %14 : vector<16x128xf32>
      %c0_14 = arith.constant 0 : index
      %c0_15 = arith.constant 0 : index
      %16 = vector.load %arg6[%c0_14, %c0_15] : memref<16x128xf32, #tpu.memory_space<vmem>>, vector<16x128xf32>
      tpu.vector_store %arg6[%c0_14, %c0_15], %15 {strides = array<i32>} : memref<16x128xf32, #tpu.memory_space<vmem>>, vector<16x128xf32>,
    } else {
    }
    return
  }
  func.func @transform_0(%arg0: i32, %arg1: i32, %arg2: i32) -> (i32, i32) {
    %c0_i32 = arith.constant 0 : i32
    return %arg0, %arg2 : i32, i32
  }
  func.func @transform_1(%arg0: i32, %arg1: i32, %arg2: i32) -> (i32, i32) {
    %c0_i32 = arith.constant 0 : i32
    return %arg2, %arg1 : i32, i32
  }
  func.func @transform_2(%arg0: i32, %arg1: i32, %arg2: i32) -> (i32, i32) {
    %c0_i32 = arith.constant 0 : i32
    %c0_i32_0 = arith.constant 0 : i32
    return %c0_i32, %arg1 : i32, i32
  }
  func.func @transform_3(%arg0: i32, %arg1: i32, %arg2: i32) -> (i32, i32) {
    %c0_i32 = arith.constant 0 : i32
    return %arg0, %arg1 : i32, i32
  }
}

</mosaic_0001>

<bundles_post_ra>
// kernel: tpu_custom_call.1
= control target key start
LH: loop header
LB: loop body
LE: loop exit
PB: predicated region body
PF: predicated region fallthrough
CT: control target
= control target key end

     0   :  { %8 = vsyncpa [#allocation4], 0  ;;  %s400_s0 = inlined_call_operand.hbm [shape: bf16[16,128], index: 0, kind: input, shape index: {}]   ;;  %s401_s1 = inlined_call_operand.hbm [shape: bf16[128,128], index: 1, kind: input, shape index: {}]   ;;  %s402_s2 = inlined_call_operand.vmem [shape: f32[1,128], index: 2, kind: input, shape index: {}]   ;;  %s403_s3 = inlined_call_operand.hbm [shape: f32[16,128], index: 3, kind: output, shape index: {}]  }
   0x1   :  { %9 = vsyncpa [#allocation7], 0 }
   0x2   :  { %10 = vsyncpa [#allocation5], 0  ;;  %s332_s12 = smov [#allocation3]   ;;  %s260_s16 = scalar_lea.hbm %s400_s0, 128 }
   0x3   :  { %s16_s13 = sshll.u32 %s332_s12, 4  ;;  %p261_p0 = scmp.ne.s32.totalorder %s400_s0, %s260_s16  ;;  %s17_s13 = int_to_ptr.vmem [resolvable:$true] %s16_s13 }
   0x4   :  { %p264_p1 = scmp.lt.u32.totalorder %s260_s16, %s400_s0 }
   0x6   :  { %p266_p2 = pnand %p264_p1, %p261_p0 }
   0x8   :  { %269 = shalt.err (!%p266_p2)
}
   0x9   :  { %s270_s21 = scalar_lea.vmem %s17_s13, 128  ;;  %p275_p4 = scmp.lt.s32.totalorder %s17_s13, %s17_s13 }
   0xa   :  { %p271_p3 = scmp.ne.s32.totalorder %s17_s13, %s270_s21  ;;  %p276_p5 = scmp.lt.s32.totalorder %s270_s21, %s270_s21 }
   0xc   :  { %p277_p6 = por %p276_p5, %p275_p4 }
   0xe   :  { %p278_p7 = pnand %p277_p6, %p271_p3 }
  0x10   :  { %281 = shalt.err (!%p278_p7)
}
  0x11   :  { %s333_s22 = smov 64   ;;  %s334_s23 = smov 4  }
  0x12   :  { %22 = dma.hbm_to_vmem [thread:$0]  %s400_s0, 128, %s17_s13, [#allocation4], %s333_s22, %s333_s22, %s334_s23  }
  0x13   :  { %s335_s26 = smov [#allocation6]   ;;  %s282_s30 = scalar_lea.hbm %s401_s1, 1024 }
  0x14   :  { %s28_s27 = sshll.u32 %s335_s26, 4  ;;  %p283_p8 = scmp.ne.s32.totalorder %s401_s1, %s282_s30  ;;  %s29_s27 = int_to_ptr.vmem [resolvable:$true] %s28_s27 }
  0x15   :  { %p286_p9 = scmp.lt.u32.totalorder %s282_s30, %s401_s1 }
  0x17   :  { %p288_p10 = pnand %p286_p9, %p283_p8 }
  0x19   :  { %291 = shalt.err (!%p288_p10)
}
  0x1a   :  { %s292_s8 = scalar_lea.vmem %s29_s27, 1024  ;;  %p297_p12 = scmp.lt.s32.totalorder %s29_s27, %s29_s27 }
  0x1b   :  { %p293_p11 = scmp.ne.s32.totalorder %s29_s27, %s292_s8  ;;  %p298_p13 = scmp.lt.s32.totalorder %s292_s8, %s292_s8 }
  0x1d   :  { %p299_p0 = por %p298_p13, %p297_p12 }
  0x1f   :  { %p300_p1 = pnand %p299_p0, %p293_p11 }
  0x21   :  { %303 = shalt.err (!%p300_p1)
}
  0x22   :  { %34 = dma.hbm_to_vmem [thread:$0]  %s401_s1, 1024, %s29_s27, [#allocation7], %s333_s22, %s333_s22, %s334_s23  }
  0x23   :  { %326 = dma.done.wait [#allocation4], 128  }
  0x24   :  { %327 = vsyncadd [#allocation4], 4294967168 }
  0x25   :  { %328 = dma.done.wait [#allocation7], 1024  }
  0x26   :  { %329 = vsyncadd [#allocation7], 4294966272  ;;  %v336_v0 = vmov 0.0   ;;  %vm337_vm0 = vmmov 0   ;;  %v251_v1 = vld [vmem:[#allocation6] sm:$0xff]   ;;  %v252_v2 = vld [vmem:[#allocation6 + $0x8] sm:$0xff]  }
  0x27   :  { %222 = vmatprep.subr.bf16.mxu0 %v336_v0  ;;  %238 = vmatprep.mubr.msk.bf16.mxu0 %vm337_vm0, %v336_v0  ;;  %v253_v3 = vld [vmem:[#allocation6 + $0x10] sm:$0xff]   ;;  %v254_v4 = vld [vmem:[#allocation6 + $0x18] sm:$0xff]   ;;  %v255_v5 = vld [vmem:[#allocation6 + $0x20] sm:$0xff]   ;;  %s338_s11 = smov [#allocation8]  }
  0x28   :  { %223 = vmatpush3.bf16.msra.mxu0 %v251_v1  ;;  %v256_v6 = vld [vmem:[#allocation6 + $0x28] sm:$0xff]   ;;  %v257_v7 = vld [vmem:[#allocation6 + $0x30] sm:$0xff]   ;;  %v258_v8 = vld [vmem:[#allocation6 + $0x38] sm:$0xff]   ;;  %s190_s12 = sshll.u32 %s338_s11, 4  ;;  %s191_s12 = int_to_ptr.vmem [resolvable:$true] %s190_s12 }
  0x29   :  { %224 = vmatprep.subr.bf16.mxu0 %v336_v0  ;;  %v259_v9 = vld [vmem:[#allocation3] sm:$0xff]   ;;  %s304_s13 = scalar_lea.vmem %s191_s12, 256  ;;  %p309_p3 = scmp.lt.s32.totalorder %s191_s12, %s191_s12 }
  0x2a   :  { %v212_v10 = vld [vmem:[%s402_s2] ss:$0 sm:$0xff]  ;;  %p305_p2 = scmp.ne.s32.totalorder %s191_s12, %s304_s13  ;;  %p310_p4 = scmp.lt.s32.totalorder %s304_s13, %s304_s13 }
  0x2c   :  { %225 = vmatpush3.bf16.msra.mxu0 %v252_v2  ;;  %p311_p5 = por %p310_p4, %p309_p3 }
  0x2d   :  { %226 = vmatprep.subr.bf16.mxu0 %v336_v0 }
  0x2e   :  { %p312_p6 = pnand %p311_p5, %p305_p2 }
  0x30   :  { %227 = vmatpush3.bf16.msra.mxu0 %v253_v3 }
  0x31   :  { %228 = vmatprep.subr.bf16.mxu0 %v336_v0 }
  0x34   :  { %229 = vmatpush3.bf16.msra.mxu0 %v254_v4 }
  0x35   :  { %230 = vmatprep.subr.bf16.mxu0 %v336_v0 }
  0x38   :  { %231 = vmatpush3.bf16.msra.mxu0 %v255_v5 }
  0x39   :  { %232 = vmatprep.subr.bf16.mxu0 %v336_v0 }
  0x3c   :  { %233 = vmatpush3.bf16.msra.mxu0 %v256_v6 }
  0x3d   :  { %234 = vmatprep.subr.bf16.mxu0 %v336_v0 }
  0x40   :  { %235 = vmatpush3.bf16.msra.mxu0 %v257_v7 }
  0x41   :  { %236 = vmatprep.subr.bf16.mxu0 %v336_v0 }
  0x44   :  { %237 = vmatpush3.bf16.msra.mxu0 %v258_v8 }
  0x47   :  { %239 = vmatmul.mubr.bf16.vlgmr.msra.gmra.mrb[0].mxu0 %v259_v9 }
 0x11a   :  { %v158_v11 = vpop.f32.mrb[0].mxu0 }
 0x11b   :  { %v181_v12 = vadd.f32 %v212_v10, %v158_v11  ;;  %v240_v13 = vpop.f32.mrb[1].mxu0 }
 0x11c   :  { %v161_v14 = vpop.f32.mrb[2].mxu0 }
 0x11d   :  { %183 = vst [vmem:[#allocation8] sm:$0xff] %v181_v12  ;;  %v182_v15 = vadd.f32 %v212_v10, %v161_v14  ;;  %v241_v16 = vpop.f32.mrb[3].mxu0 }
 0x11f   :  { %184 = vst [vmem:[#allocation8 + $0x8] sm:$0xff] %v182_v15 }
 0x120   :  { %315 = shalt.err (!%p312_p6)
}
 0x121   :  { %s316_s15 = scalar_lea.hbm %s403_s3, 256 }
 0x122   :  { %p317_p7 = scmp.ne.s32.totalorder %s403_s3, %s316_s15  ;;  %p320_p8 = scmp.lt.u32.totalorder %s316_s15, %s403_s3 }
 0x124   :  { %p322_p9 = pnand %p320_p8, %p317_p7 }
 0x126   :  { %325 = shalt.err (!%p322_p9)
}
 0x127   :  { %s339_s20 = smov 128   ;;  %s340_s21 = smov 8  }
 0x128   :  { %196 = dma.vmem_to_hbm [thread:$0]  %s191_s12, 256, %s403_s3, [#allocation5], %s339_s20, %s339_s20, %s340_s21  }
 0x129   :  { %330 = dma.done.wait [#allocation5], 256  }
 0x12a   :  { %331 = vsyncadd [#allocation5], 4294967040 }
 0x12b   :  { %200 = vsyncpa [#allocation4], 1 }
 0x12c   :  { %201 = vsyncpa [#allocation7], 1 }
 0x12d   :  { %202 = vsyncpa [#allocation5], 1 }

</bundles_post_ra>
